<compile_context>
chip_gen: v6e
topology: v6e:2x2x1
jax: 0.10.0
libtpu: 0.0.40
codegen_flags: <defaults>
</compile_context>

<pallas_src>
import functools

import jax
import jax.numpy as jnp
from jax.experimental import pallas as pl
from jax.experimental.pallas import tpu as pltpu

INPUTS = 313
OUTPUTS = 9
H1, H2, H3 = 64, 32, 16

DEFAULT_TILE_B = 512   # rows per grid step; ~640 KiB f32 tile, double-buffered


def _round_up(n, m):
    return ((n + m - 1) // m) * m


def dqn_kernel(x_ref,
               w1_ref, b1_ref,
               w2_ref, b2_ref,
               w3_ref, b3_ref,
               w4_ref, b4_ref,
               o_ref):
    # x arrives as f32 straight from HBM; cast to bf16 in VMEM so every matmul is a
    # native bf16 MXU op with f32 accumulation.
    x = x_ref[...].astype(jnp.bfloat16)
    h = jnp.dot(x, w1_ref[...], preferred_element_type=jnp.float32)
    h = jnp.maximum(h + b1_ref[...], 0.0)
    h = jnp.dot(h.astype(jnp.bfloat16), w2_ref[...], preferred_element_type=jnp.float32)
    h = jnp.maximum(h + b2_ref[...], 0.0)
    h = jnp.dot(h.astype(jnp.bfloat16), w3_ref[...], preferred_element_type=jnp.float32)
    h = jnp.maximum(h + b3_ref[...], 0.0)
    h = jnp.dot(h.astype(jnp.bfloat16), w4_ref[...], preferred_element_type=jnp.float32)
    o_ref[...] = (h + b4_ref[...]).astype(o_ref.dtype)


@functools.partial(jax.jit, static_argnames=("tile_b",))
def _dqn_pallas(x, w1, b1, w2, b2, w3, b3, w4, b4, *, tile_b):
    bpad = x.shape[0]
    grid = (bpad // tile_b,)

    const2d = lambda i: (0, 0)          # weights/biases: same block every step
    batch_map = lambda i: (i, 0)        # x / out: walk the batch

    in_specs = [
        pl.BlockSpec((tile_b, INPUTS), batch_map),   # x: streamed per grid step
        pl.BlockSpec((INPUTS, H1), const2d),          # weights/biases: VMEM-resident
        pl.BlockSpec((1, H1), const2d),
        pl.BlockSpec((H1, H2), const2d),
        pl.BlockSpec((1, H2), const2d),
        pl.BlockSpec((H2, H3), const2d),
        pl.BlockSpec((1, H3), const2d),
        pl.BlockSpec((H3, OUTPUTS), const2d),
        pl.BlockSpec((1, OUTPUTS), const2d),
    ]
    return pl.pallas_call(
        dqn_kernel,
        out_shape=jax.ShapeDtypeStruct((bpad, OUTPUTS), jnp.float32),
        grid=grid,
        in_specs=in_specs,
        out_specs=pl.BlockSpec((tile_b, OUTPUTS), batch_map),
        compiler_params=pltpu.CompilerParams(
            dimension_semantics=("parallel",)),
    )(x, w1, b1, w2, b2, w3, b3, w4, b4)


def dqn_forward(x, params, tile_b=DEFAULT_TILE_B):
    """x: (B, 313) f32. params: output of prepare_params (bf16 weights, f32 biases)."""
    B = x.shape[0]
    tile_b = min(tile_b, _round_up(max(B, 1), 8))   # shrink tile for small batches
    bpad = _round_up(B, tile_b)
    x = x.astype(jnp.float32)
    if bpad != B:
        x = jnp.pad(x, ((0, bpad - B), (0, 0)))
    out = _dqn_pallas(x,
                      params["w1"], params["b1"],
                      params["w2"], params["b2"],
                      params["w3"], params["b3"],
                      params["w4"], params["b4"],
                      tile_b=tile_b)
    return out[:B] if bpad != B else out


def init_params(key):
    """nn.Linear-style init (uniform +/- 1/sqrt(fan_in)); weights stored as (in, out)."""
    dims = [(INPUTS, H1), (H1, H2), (H2, H3), (H3, OUTPUTS)]
    params = {}
    keys = jax.random.split(key, 2 * len(dims))
    for i, (fin, fout) in enumerate(dims):
        bound = 1.0 / (fin ** 0.5)
        params[f"w{i + 1}"] = jax.random.uniform(
            keys[2 * i], (fin, fout), jnp.float32, -bound, bound)
        params[f"b{i + 1}"] = jax.random.uniform(
            keys[2 * i + 1], (1, fout), jnp.float32, -bound, bound)
    return params


def prepare_params(params_f32):
    """Cast weights to bf16 once (amortized); biases stay f32."""
    out = {}
    for i in (1, 2, 3, 4):
        out[f"w{i}"] = params_f32[f"w{i}"].astype(jnp.bfloat16)
        out[f"b{i}"] = params_f32[f"b{i}"]
    return out


def dqn_reference(x, params_f32):
    """Pure-JAX reference using the same bf16-quantized x / weights, f32 math."""
    xq = x.astype(jnp.bfloat16).astype(jnp.float32)
    wq = lambda w: w.astype(jnp.bfloat16).astype(jnp.float32)
    h = jnp.maximum(xq @ wq(params_f32["w1"]) + params_f32["b1"], 0.0)
    h = jnp.maximum(h @ wq(params_f32["w2"]) + params_f32["b2"], 0.0)
    h = jnp.maximum(h @ wq(params_f32["w3"]) + params_f32["b3"], 0.0)
    return h @ wq(params_f32["w4"]) + params_f32["b4"]


if __name__ == "__main__":
    key = jax.random.PRNGKey(0)
    k_param, k_x = jax.random.split(key)
    params_f32 = init_params(k_param)
    params = prepare_params(params_f32)

    B = 8
    x = jax.random.normal(k_x, (B, INPUTS), jnp.float32)

    out = dqn_forward(x, params)
    out = jax.block_until_ready(out)

    ref = dqn_reference(x, params_f32)
    assert out.shape == (B, OUTPUTS), out.shape
    max_err = float(jnp.max(jnp.abs(out - ref)))
    assert jnp.allclose(out, ref, atol=3e-2, rtol=3e-2), max_err
    print("KERNEL_OK")
</pallas_src>

<mosaic_0001>
module attributes {stable_mosaic.version = 11 : i64} {
  func.func @dqn_kernel(%arg0: i32, %arg1: memref<8x313xf32, #tpu.memory_space<vmem>>, %arg2: memref<313x64xbf16, #tpu.memory_space<vmem>>, %arg3: memref<1x64xf32, #tpu.memory_space<vmem>>, %arg4: memref<64x32xbf16, #tpu.memory_space<vmem>>, %arg5: memref<1x32xf32, #tpu.memory_space<vmem>>, %arg6: memref<32x16xbf16, #tpu.memory_space<vmem>>, %arg7: memref<1x16xf32, #tpu.memory_space<vmem>>, %arg8: memref<16x9xbf16, #tpu.memory_space<vmem>>, %arg9: memref<1x9xf32, #tpu.memory_space<vmem>>, %arg10: memref<8x9xf32, #tpu.memory_space<vmem>>) attributes {dimension_semantics = [#tpu.dimension_semantics<parallel>], iteration_bounds = array<i64: 1>, scalar_prefetch = 0 : i64, scratch_operands = 0 : i64, tpu.core_type = #tpu.core_type<tc>, window_params = [{transform_indices = @transform_0, window_bounds = array<i64: 8, 313>}, {pipeline_mode = #tpu.pipeline_mode<synchronous>, transform_indices = @transform_1, window_bounds = array<i64: 313, 64>}, {pipeline_mode = #tpu.pipeline_mode<synchronous>, transform_indices = @transform_2, window_bounds = array<i64: 1, 64>}, {pipeline_mode = #tpu.pipeline_mode<synchronous>, transform_indices = @transform_3, window_bounds = array<i64: 64, 32>}, {pipeline_mode = #tpu.pipeline_mode<synchronous>, transform_indices = @transform_4, window_bounds = array<i64: 1, 32>}, {pipeline_mode = #tpu.pipeline_mode<synchronous>, transform_indices = @transform_5, window_bounds = array<i64: 32, 16>}, {pipeline_mode = #tpu.pipeline_mode<synchronous>, transform_indices = @transform_6, window_bounds = array<i64: 1, 16>}, {pipeline_mode = #tpu.pipeline_mode<synchronous>, transform_indices = @transform_7, window_bounds = array<i64: 16, 9>}, {pipeline_mode = #tpu.pipeline_mode<synchronous>, transform_indices = @transform_8, window_bounds = array<i64: 1, 9>}, {transform_indices = @transform_9, window_bounds = array<i64: 8, 9>}]} {
    %c0 = arith.constant 0 : index
    %c0_0 = arith.constant 0 : index
    %0 = vector.load %arg1[%c0, %c0_0] : memref<8x313xf32, #tpu.memory_space<vmem>>, vector<8x313xf32>
    %1 = arith.truncf %0 : vector<8x313xf32> to vector<8x313xbf16>
    %c0_1 = arith.constant 0 : index
    %c0_2 = arith.constant 0 : index
    %2 = vector.load %arg2[%c0_1, %c0_2] : memref<313x64xbf16, #tpu.memory_space<vmem>>, vector<313x64xbf16>
    %cst = arith.constant dense<0.000000e+00> : vector<8x64xf32>
    %3 = tpu.matmul %1, %2, %cst {dimension_numbers = #tpu.dot_dimension_numbers<[1], [0], [0], [1], [0, 0, 1, 1], [], []>} : vector<8x313xbf16>, vector<313x64xbf16>, vector<8x64xf32> -> vector<8x64xf32>
    %c0_3 = arith.constant 0 : index
    %c0_4 = arith.constant 0 : index
    %4 = vector.load %arg3[%c0_3, %c0_4] : memref<1x64xf32, #tpu.memory_space<vmem>>, vector<1x64xf32>
    %5 = vector.broadcast %4 : vector<1x64xf32> to vector<8x64xf32>
    %6 = arith.addf %3, %5 : vector<8x64xf32>
    %cst_5 = arith.constant 0.000000e+00 : f32
    %7 = vector.broadcast %cst_5 : f32 to vector<8x64xf32>
    %8 = arith.maximumf %6, %7 : vector<8x64xf32>
    %9 = arith.truncf %8 : vector<8x64xf32> to vector<8x64xbf16>
    %c0_6 = arith.constant 0 : index
    %c0_7 = arith.constant 0 : index
    %10 = vector.load %arg4[%c0_6, %c0_7] : memref<64x32xbf16, #tpu.memory_space<vmem>>, vector<64x32xbf16>
    %cst_8 = arith.constant dense<0.000000e+00> : vector<8x32xf32>
    %11 = tpu.matmul %9, %10, %cst_8 {dimension_numbers = #tpu.dot_dimension_numbers<[1], [0], [0], [1], [0, 0, 1, 1], [], []>} : vector<8x64xbf16>, vector<64x32xbf16>, vector<8x32xf32> -> vector<8x32xf32>
    %c0_9 = arith.constant 0 : index
    %c0_10 = arith.constant 0 : index
    %12 = vector.load %arg5[%c0_9, %c0_10] : memref<1x32xf32, #tpu.memory_space<vmem>>, vector<1x32xf32>
    %13 = vector.broadcast %12 : vector<1x32xf32> to vector<8x32xf32>
    %14 = arith.addf %11, %13 : vector<8x32xf32>
    %cst_11 = arith.constant 0.000000e+00 : f32
    %15 = vector.broadcast %cst_11 : f32 to vector<8x32xf32>
    %16 = arith.maximumf %14, %15 : vector<8x32xf32>
    %17 = arith.truncf %16 : vector<8x32xf32> to vector<8x32xbf16>
    %c0_12 = arith.constant 0 : index
    %c0_13 = arith.constant 0 : index
    %18 = vector.load %arg6[%c0_12, %c0_13] : memref<32x16xbf16, #tpu.memory_space<vmem>>, vector<32x16xbf16>
    %cst_14 = arith.constant dense<0.000000e+00> : vector<8x16xf32>
    %19 = tpu.matmul %17, %18, %cst_14 {dimension_numbers = #tpu.dot_dimension_numbers<[1], [0], [0], [1], [0, 0, 1, 1], [], []>} : vector<8x32xbf16>, vector<32x16xbf16>, vector<8x16xf32> -> vector<8x16xf32>
    %c0_15 = arith.constant 0 : index
    %c0_16 = arith.constant 0 : index
    %20 = vector.load %arg7[%c0_15, %c0_16] : memref<1x16xf32, #tpu.memory_space<vmem>>, vector<1x16xf32>
    %21 = vector.broadcast %20 : vector<1x16xf32> to vector<8x16xf32>
    %22 = arith.addf %19, %21 : vector<8x16xf32>
    %cst_17 = arith.constant 0.000000e+00 : f32
    %23 = vector.broadcast %cst_17 : f32 to vector<8x16xf32>
    %24 = arith.maximumf %22, %23 : vector<8x16xf32>
    %25 = arith.truncf %24 : vector<8x16xf32> to vector<8x16xbf16>
    %c0_18 = arith.constant 0 : index
    %c0_19 = arith.constant 0 : index
    %26 = vector.load %arg8[%c0_18, %c0_19] : memref<16x9xbf16, #tpu.memory_space<vmem>>, vector<16x9xbf16>
    %cst_20 = arith.constant dense<0.000000e+00> : vector<8x9xf32>
    %27 = tpu.matmul %25, %26, %cst_20 {dimension_numbers = #tpu.dot_dimension_numbers<[1], [0], [0], [1], [0, 0, 1, 1], [], []>} : vector<8x16xbf16>, vector<16x9xbf16>, vector<8x9xf32> -> vector<8x9xf32>
    %c0_21 = arith.constant 0 : index
    %c0_22 = arith.constant 0 : index
    %28 = vector.load %arg9[%c0_21, %c0_22] : memref<1x9xf32, #tpu.memory_space<vmem>>, vector<1x9xf32>
    %29 = vector.broadcast %28 : vector<1x9xf32> to vector<8x9xf32>
    %30 = arith.addf %27, %29 : vector<8x9xf32>
    %c0_23 = arith.constant 0 : index
    %c0_24 = arith.constant 0 : index
    %31 = vector.load %arg10[%c0_23, %c0_24] : memref<8x9xf32, #tpu.memory_space<vmem>>, vector<8x9xf32>
    tpu.vector_store %arg10[%c0_23, %c0_24], %30 {strides = array<i32>} : memref<8x9xf32, #tpu.memory_space<vmem>>, vector<8x9xf32>,
    return
  }
  func.func @transform_0(%arg0: i32) -> (i32, i32) {
    %c0_i32 = arith.constant 0 : i32
    %c0_i32_0 = arith.constant 0 : i32
    return %arg0, %c0_i32 : i32, i32
  }
  func.func @transform_1(%arg0: i32) -> (i32, i32) {
    %c0_i32 = arith.constant 0 : i32
    %c0_i32_0 = arith.constant 0 : i32
    %c0_i32_1 = arith.constant 0 : i32
    return %c0_i32, %c0_i32_0 : i32, i32
  }
  func.func @transform_2(%arg0: i32) -> (i32, i32) {
    %c0_i32 = arith.constant 0 : i32
    %c0_i32_0 = arith.constant 0 : i32
    %c0_i32_1 = arith.constant 0 : i32
    return %c0_i32, %c0_i32_0 : i32, i32
  }
  func.func @transform_3(%arg0: i32) -> (i32, i32) {
    %c0_i32 = arith.constant 0 : i32
    %c0_i32_0 = arith.constant 0 : i32
    %c0_i32_1 = arith.constant 0 : i32
    return %c0_i32, %c0_i32_0 : i32, i32
  }
  func.func @transform_4(%arg0: i32) -> (i32, i32) {
    %c0_i32 = arith.constant 0 : i32
    %c0_i32_0 = arith.constant 0 : i32
    %c0_i32_1 = arith.constant 0 : i32
    return %c0_i32, %c0_i32_0 : i32, i32
  }
  func.func @transform_5(%arg0: i32) -> (i32, i32) {
    %c0_i32 = arith.constant 0 : i32
    %c0_i32_0 = arith.constant 0 : i32
    %c0_i32_1 = arith.constant 0 : i32
    return %c0_i32, %c0_i32_0 : i32, i32
  }
  func.func @transform_6(%arg0: i32) -> (i32, i32) {
    %c0_i32 = arith.constant 0 : i32
    %c0_i32_0 = arith.constant 0 : i32
    %c0_i32_1 = arith.constant 0 : i32
    return %c0_i32, %c0_i32_0 : i32, i32
  }
  func.func @transform_7(%arg0: i32) -> (i32, i32) {
    %c0_i32 = arith.constant 0 : i32
    %c0_i32_0 = arith.constant 0 : i32
    %c0_i32_1 = arith.constant 0 : i32
    return %c0_i32, %c0_i32_0 : i32, i32
  }
  func.func @transform_8(%arg0: i32) -> (i32, i32) {
    %c0_i32 = arith.constant 0 : i32
    %c0_i32_0 = arith.constant 0 : i32
    %c0_i32_1 = arith.constant 0 : i32
    return %c0_i32, %c0_i32_0 : i32, i32
  }
  func.func @transform_9(%arg0: i32) -> (i32, i32) {
    %c0_i32 = arith.constant 0 : i32
    %c0_i32_0 = arith.constant 0 : i32
    return %arg0, %c0_i32 : i32, i32
  }
}

</mosaic_0001>

<bundles_post_ra>
// kernel: _dqn_pallas.1
= control target key start
LH: loop header
LB: loop body
LE: loop exit
PB: predicated region body
PF: predicated region fallthrough
CT: control target
= control target key end

     0   :  { %v691_v2 = vmov 0.0   ;;  %vm210_vm0 = vcmask 1043456   ;;  %vm211_vm1 = vcmask 1044480   ;;  %v692_v6 = vmov 65535   ;;  %s869_s0 = inlined_call_operand.vmem [shape: f32[8,313], index: 0, kind: input, shape index: {}]   ;;  %s870_s1 = inlined_call_operand.vmem [shape: bf16[313,64], index: 1, kind: input, shape index: {}]   ;;  %s871_s2 = inlined_call_operand.vmem [shape: f32[1,64], index: 2, kind: input, shape index: {}]   ;;  %s872_s3 = inlined_call_operand.vmem [shape: bf16[64,32], index: 3, kind: input, shape index: {}]   ;;  %s873_s4 = inlined_call_operand.vmem [shape: f32[1,32], index: 4, kind: input, shape index: {}]   ;;  %s874_s5 = inlined_call_operand.vmem [shape: bf16[32,16], index: 5, kind: input, shape index: {}]   ;;  %s875_s6 = inlined_call_operand.vmem [shape: f32[1,16], index: 6, kind: input, shape index: {}]   ;;  %s876_s7 = inlined_call_operand.vmem [shape: bf16[16,9], index: 7, kind: input, shape index: {}]   ;;  %s877_s8 = inlined_call_operand.vmem [shape: f32[1,9], index: 8, kind: input, shape index: {}]   ;;  %s878_s9 = inlined_call_operand.hbm [shape: f32[8,9], index: 9, kind: output, shape index: {}]  }
   0x1   :  { %v642_v0 = vld [vmem:[%s870_s1 + $0x78] sm:$0xff]   ;;  %600 = vmatprep.subr.bf16.mxu1 %v691_v2  ;;  %v644_v3 = vld [vmem:[%s870_s1 + $0x70] sm:$0xff]   ;;  %v646_v5 = vld [vmem:[%s870_s1 + $0x68] sm:$0xff]   ;;  %v212_v7 = vsel %vm210_vm0, 4294967295, %v692_v6  ;;  %vm693_vm2 = vmmov 0   ;;  %vm206_vm3 = vcmask 465920  }
   0x2   :  { %v643_v1 = vld [vmem:[%s870_s1 + $0x38] sm:$0xff]   ;;  %563 = vmatprep.subr.bf16.mxu0 %v642_v0  ;;  %v645_v4 = vld [vmem:[%s870_s1 + $0x30] sm:$0xff]   ;;  %v647_v8 = vld [vmem:[%s870_s1 + $0x28] sm:$0xff]   ;;  %608 = vmatprep.mubr.msk.bf16.mxu1 %vm693_vm2, %v691_v2  ;;  %v213_v10 = vsel %vm211_vm1, %v212_v7, 0 }
   0x3   :  { %564 = vmatpush3.bf16.msra.mxu0 %v643_v1  ;;  %v648_v9 = vld [vmem:[%s870_s1 + $0x60] sm:$0xff]   ;;  %v652_v11 = vld [vmem:[%s870_s1 + $0x98] sm:$0x1f]   ;;  %v655_v15 = vld [vmem:[%s870_s1 + $0x90] sm:$0xff]  }
   0x4   :  { %565 = vmatprep.subr.bf16.mxu0 %v644_v3  ;;  %v649_v12 = vld [vmem:[%s870_s1 + $0x20] sm:$0xff]   ;;  %v650_v13 = vld [vmem:[%s870_s1 + $0x58] sm:$0xff]   ;;  %v215_v14 = vand.u32 %v652_v11, %v213_v10  ;;  %v653_v17 = vld [vmem:[%s870_s1 + $0x50] sm:$0xff]  }
   0x5   :  { %v651_v16 = vld [vmem:[%s870_s1 + $0x18] sm:$0xff]   ;;  %v658_v18 = vld [vmem:[%s870_s1 + $0x88] sm:$0xff]   ;;  %v654_v19 = vld [vmem:[%s870_s1 + $0x10] sm:$0xff]  }
   0x6   :  { %601 = vmatpush3.bf16.msra.mxu1 %v215_v14  ;;  %v656_v20 = vld [vmem:[%s870_s1 + $0x48] sm:$0xff]   ;;  %v661_v21 = vld [vmem:[%s870_s1 + $0x80] sm:$0xff]   ;;  %v36_v25 = vld [vmem:[%s869_s0 + $0x10] sm:$0xff] }
   0x7   :  { %566 = vmatpush3.bf16.msra.mxu0 %v645_v4  ;;  %602 = vmatprep.subr.bf16.mxu1 %v691_v2  ;;  %v35_v22 = vld [vmem:[%s869_s0 + $0x8] sm:$0xff]  ;;  %v659_v26 = vld [vmem:[%s870_s1 + $0x40] sm:$0xff]   ;;  %v39_v27 = vpack.c.bf16 %v36_v25, %v36_v25  ;;  %v662_v28 = vld [vmem:[%s872_s3 + $0x18] sm:$0xff]  }
   0x8   :  { %567 = vmatprep.subr.bf16.mxu0 %v646_v5  ;;  %v657_v23 = vld [vmem:[%s870_s1 + $0x8] sm:$0xff]   ;;  %v38_v24 = vpack.c.bf16 %v35_v22, %v35_v22 }
   0xa   :  { %603 = vmatpush3.bf16.msra.mxu1 %v655_v15  ;;  %249 = vmatprep.mubr.bf16.mxu0 %v38_v24 }
   0xb   :  { %568 = vmatpush3.bf16.msra.mxu0 %v647_v8  ;;  %604 = vmatprep.subr.bf16.mxu1 %v691_v2 }
   0xc   :  { %569 = vmatprep.subr.bf16.mxu0 %v648_v9 }
   0xe   :  { %605 = vmatpush3.bf16.msra.mxu1 %v658_v18 }
   0xf   :  { %570 = vmatpush3.bf16.msra.mxu0 %v649_v12  ;;  %606 = vmatprep.subr.bf16.mxu1 %v691_v2 }
  0x10   :  { %571 = vmatprep.subr.bf16.mxu0 %v650_v13 }
  0x12   :  { %607 = vmatpush3.bf16.msra.mxu1 %v661_v21 }
  0x13   :  { %572 = vmatpush3.bf16.msra.mxu0 %v651_v16 }
  0x14   :  { %573 = vmatprep.subr.bf16.mxu0 %v653_v17 }
  0x17   :  { %574 = vmatpush3.bf16.msra.mxu0 %v654_v19 }
  0x18   :  { %575 = vmatprep.subr.bf16.mxu0 %v656_v20 }
  0x19   :  { %14 = vsyncpa [#allocation3], 0  ;;  %v660_v29 = vld [vmem:[%s870_s1] sm:$0xff]   ;;  %612 = vmatprep.subr.bf16.mxu1 %v691_v2  ;;  %609 = vmatmul.mubr.msk.bf16.vlgmr.msra.gmra.mxu1 %vm206_vm3, %v39_v27  ;;  %v663_v32 = vld [vmem:[%s872_s3 + $0x10] sm:$0xff]   ;;  %vm338_vm4 = vcmask 523264   ;;  %vm407_vm5 = vcmask 261120  }
  0x1a   :  { %v34_v30 = vld [vmem:[%s869_s0] sm:$0xff]  ;;  %613 = vmatpush3.bf16.msra.mxu1 %v662_v28  ;;  %620 = vmatprep.mubr.msk.bf16.mxu1 %vm693_vm2, %v691_v2  ;;  %v664_v33 = vld [vmem:[%s872_s3 + $0x8] sm:$0xff]   ;;  %vm468_vm6 = vcmask 130048   ;;  %s694_s28 = smov [#allocation2]   ;;  %vm512_vm7 = vcmask 72704  }
  0x1b   :  { %576 = vmatpush3.bf16.msra.mxu0 %v657_v23  ;;  %v37_v31 = vpack.c.bf16 %v34_v30, %v34_v30  ;;  %614 = vmatprep.subr.bf16.mxu1 %v691_v2  ;;  %v665_v34 = vld [vmem:[%s872_s3] sm:$0xff]   ;;  %v666_v35 = vld [vmem:[%s874_s5 + $0x8] sm:$0xff]   ;;  %s520_s29 = sshll.u32 %s694_s28, 4  ;;  %s521_s29 = int_to_ptr.vmem [resolvable:$true] %s520_s29 }
  0x1c   :  { %577 = vmatprep.subr.bf16.mxu0 %v659_v26  ;;  %v528_v41 = vld [vmem:[%s871_s2] ss:$0 sm:$0xff]  ;;  %p674_p1 = scmp.lt.s32.totalorder %s521_s29, %s521_s29 }
  0x1d   :  { %v667_v50 = vld [vmem:[%s874_s5] sm:$0xff]  }
  0x1e   :  { %615 = vmatpush3.bf16.msra.mxu1 %v663_v32  ;;  %v668_v51 = vld [vmem:[%s876_s7] sm:$0xff]  }
  0x1f   :  { %578 = vmatpush3.bf16.msra.mxu0 %v660_v29  ;;  %616 = vmatprep.subr.bf16.mxu1 %v691_v2  ;;  %v550_v52 = vld [vmem:[%s873_s4] ss:$0 sm:$0xff] }
  0x20   :  { %624 = vmatprep.subr.bf16.mxu0 %v691_v2  ;;  %v556_v60 = vld [vmem:[%s875_s6] ss:$0 sm:$0xff]  ;;  %s669_s6 = scalar_lea.vmem %s521_s29, 128 }
  0x21   :  { %v560_v4 = vld [vmem:[%s877_s8] ss:$0 sm:$0xff]  ;;  %p670_p0 = scmp.ne.s32.totalorder %s521_s29, %s669_s6  ;;  %p675_p2 = scmp.lt.s32.totalorder %s669_s6, %s669_s6 }
  0x22   :  { %250 = vmatmul.mubr.bf16.vlgmr.msra.gmra.mxu0 %v37_v31  ;;  %617 = vmatpush3.bf16.msra.mxu1 %v664_v33 }
  0x23   :  { %628 = vmatprep.mubr.msk.bf16.mxu0 %vm693_vm2, %v691_v2  ;;  %618 = vmatprep.subr.bf16.mxu1 %v691_v2  ;;  %p676_p3 = por %p675_p2, %p674_p1 }
  0x24   :  { %625 = vmatpush3.bf16.msra.mxu0 %v666_v35 }
  0x25   :  { %626 = vmatprep.subr.bf16.mxu0 %v691_v2  ;;  %p677_p4 = pnand %p676_p3, %p670_p0 }
  0x26   :  { %619 = vmatpush3.bf16.msra.mxu1 %v665_v34 }
  0x27   :  { %632 = vmatprep.subr.bf16.mxu1 %v691_v2 }
  0x28   :  { %627 = vmatpush3.bf16.msra.mxu0 %v667_v50 }
  0xd9   :  { %v291_v36 = vpop.f32.mrf.mxu1 }
  0xdb   :  { %v610_v37 = vpop.f32.mrf.mxu1 }
  0xdd   :  { %v294_v38 = vpop.f32.mrf.mxu1 }
  0xdf   :  { %v611_v40 = vpop.f32.mrf.mxu1 }
  0xe2   :  { %v579_v39 = vpop.f32.mrf.mxu0 }
  0xe4   :  { %v580_v42 = vpop.f32.mrf.mxu0 }
  0xe5   :  { %v581_v43 = vadd.f32 %v580_v42, %v579_v39 }
  0xe6   :  { %v582_v44 = vpop.f32.mrf.mxu0 }
  0xe7   :  { %v252_v45 = vadd.f32 %v581_v43, %v528_v41 }
  0xe8   :  { %v583_v46 = vpop.f32.mrf.mxu0 }
  0xe9   :  { %v292_v47 = vadd.f32 %v291_v36, %v252_v45 }
  0xeb   :  { %v297_v48 = vmax.f32 %v292_v47, 0.0 }
  0xed   :  { %v298_v49 = vpack.c.bf16 %v297_v48, %v297_v48 }
  0xef   :  { %621 = vmatmul.mubr.msk.bf16.vlgmr.msra.gmra.mxu1 %vm338_vm4, %v298_v49 }
  0xf0   :  { %634 = vmatprep.mubr.msk.bf16.mxu1 %vm693_vm2, %v691_v2  ;;  %633 = vmatpush3.bf16.msra.mxu1 %v668_v51 }
 0x1af   :  { %v376_v53 = vpop.f32.mrf.mxu1 }
 0x1b0   :  { %v377_v54 = vadd.f32 %v550_v52, %v376_v53 }
 0x1b1   :  { %v622_v55 = vpop.f32.mrf.mxu1 }
 0x1b2   :  { %v382_v56 = vmax.f32 %v377_v54, 0.0 }
 0x1b3   :  { %v379_v57 = vpop.f32.mrf.mxu1 }
 0x1b4   :  { %v383_v58 = vpack.c.bf16 %v382_v56, %v382_v56 }
 0x1b5   :  { %v623_v59 = vpop.f32.mrf.mxu1 }
 0x1b6   :  { %629 = vmatmul.mubr.msk.bf16.vlgmr.msra.gmra.mxu0 %vm407_vm5, %v383_v58 }
 0x276   :  { %v445_v61 = vpop.f32.mrf.mxu0 }
 0x277   :  { %v446_v62 = vadd.f32 %v556_v60, %v445_v61 }
 0x278   :  { %v630_v63 = vpop.f32.mrf.mxu0 }
 0x279   :  { %v451_v0 = vmax.f32 %v446_v62, 0.0 }
 0x27a   :  { %v448_v1 = vpop.f32.mrf.mxu0 }
 0x27b   :  { %v452_v2 = vpack.c.bf16 %v451_v0, %v451_v0 }
 0x27c   :  { %v631_v3 = vpop.f32.mrf.mxu0 }
 0x27d   :  { %635 = vmatmul.mubr.msk.bf16.vlgmr.msra.gmra.mxu1 %vm468_vm6, %v452_v2 }
 0x33d   :  { %v506_v5 = vpop.f32.mrf.mxu1 }
 0x33e   :  { %v507_v6 = vadd.f32 %v560_v4, %v506_v5 }
 0x33f   :  { %v636_v7 = vpop.f32.mrf.mxu1 }
 0x340   :  { %513 = vst.msk [vmem:[#allocation2] sm:$0xff] %vm512_vm7, %v507_v6 }
 0x341   :  { %v509_v8 = vpop.f32.mrf.mxu1 }
 0x342   :  { %680 = shalt.err (!%p677_p4)
}
 0x343   :  { %523 = dma.vmem_to_hbm [thread:$0]  %s521_s29, 128, %s878_s9, [#allocation3]   ;;  %v637_v9 = vpop.f32.mrf.mxu1 }
 0x344   :  { %689 = dma.done.wait [#allocation3], 128  }
 0x345   :  { %690 = vsyncadd [#allocation3], 4294967168 }
 0x346   :  { %527 = vsyncpa [#allocation3], 1 }

</bundles_post_ra>
